<compile_context>
chip_gen: v6e
topology: v6e:2x2x1
jax: 0.10.0
libtpu: 0.0.40
codegen_flags: <defaults>
</compile_context>

<pallas_src>
import functools

import jax
import jax.numpy as jnp
from jax.experimental import pallas as pl
from jax.experimental.pallas import tpu as pltpu

_LANES = 128
_SUBLANES = 8
_MAX_BLOCK_ROWS = 4096        # 4096 x 128 f32 = 2 MiB per input block
_MIN_PALLAS_ELEMS = 64 * 1024  # below this, the fused XLA path wins (launch overhead)


def _round_up(x, m):
    return (x + m - 1) // m * m


def _mask_invalid_rows(d, valid_rows):
    """Zero rows past the true row count (partial final block).  Static no-op
    when every block is fully valid.  jnp.where-select is NaN-safe."""
    block_rows = d.shape[0]
    if valid_rows % block_rows == 0:
        return d
    row = jax.lax.broadcasted_iota(jnp.int32, d.shape, 0)
    global_row = pl.program_id(0) * block_rows + row
    return jnp.where(global_row < valid_rows, d, 0.0)


def _abs_diff_partial_kernel(sr_ref, hr_ref, out_ref, *, valid_rows):
    """Per-block partial sum of |sr - hr|, reduced to an (8, 128) vector."""
    sr = sr_ref[...].astype(jnp.float32)
    hr = hr_ref[...].astype(jnp.float32)
    d = jnp.abs(sr - hr)
    d = _mask_invalid_rows(d, valid_rows)
    partial = d.reshape(-1, _SUBLANES, _LANES).sum(axis=0)     # per-vreg VPU adds
    out_ref[...] = partial.reshape(out_ref.shape)


def _loss_partial_kernel(mean_ref, sr_ref, hr_ref, z_ref, out_ref, *, valid_rows):
    """Per-block partial sum of |hr - (sr + sigma*z)| with sigma thresholding."""
    mean_sigma = mean_ref[0]                                   # scalar from SMEM
    sr = sr_ref[...].astype(jnp.float32)
    hr = hr_ref[...].astype(jnp.float32)
    z = z_ref[...].astype(jnp.float32)
    sigma = jnp.abs(sr - hr)
    sigma = jnp.where(sigma < mean_sigma, 0.0, sigma)
    d = jnp.abs(hr - (sr + sigma * z))
    d = _mask_invalid_rows(d, valid_rows)
    partial = d.reshape(-1, _SUBLANES, _LANES).sum(axis=0)
    out_ref[...] = partial.reshape(out_ref.shape)


def posterior_loss(sr, hr, coef, *, key=None, z=None,
                   min_pallas_elems=_MIN_PALLAS_ELEMS):
    """coef * mean(|hr - (sr + where(|sr-hr| < mean(|sr-hr|), 0, |sr-hr|) * z)|)."""
    assert sr.shape == hr.shape
    if z is None:
        if key is None:
            raise ValueError("provide either `key` or `z`")
        z = jax.random.normal(key, sr.shape, sr.dtype)         # torch.randn_like(sr)
    assert z.shape == sr.shape

    n = sr.size

    # Fast path / fallback: tiny tensors (two kernel launches dominate) and
    # flat sizes that are not a multiple of 128 (reshaping would require a
    # full-array pad copy) go through the fused XLA expression. Semantics and
    # accumulation dtype (f32) match the Pallas path.
    if n < min_pallas_elems or n % _LANES != 0:
        sr32, hr32, z32 = (a.astype(jnp.float32) for a in (sr, hr, z))
        sigma = jnp.abs(sr32 - hr32)
        sigma = jnp.where(sigma < sigma.mean(), 0.0, sigma)
        loss = jnp.mean(jnp.abs(hr32 - (sr32 + sigma * z32)))
        return jnp.asarray(coef, jnp.float32) * loss

    rows = n // _LANES
    # Sublane granularity: 8 for 4-byte dtypes, 16 for 2-byte, 32 for 1-byte.
    min_itemsize = min(a.dtype.itemsize for a in (sr, hr, z))
    sub_mult = _SUBLANES * max(1, 4 // min_itemsize)
    # >= 2 blocks whenever possible (so v7x's two TensorCores both stream HBM),
    # capped at _MAX_BLOCK_ROWS per block.
    target_blocks = max(2, pl.cdiv(rows, _MAX_BLOCK_ROWS))
    block_rows = min(_round_up(pl.cdiv(rows, target_blocks), sub_mult),
                     _round_up(rows, sub_mult))
    num_blocks = pl.cdiv(rows, block_rows)

    # Zero-copy, layout-preserving reshapes; native dtype streamed as-is.
    sr2 = sr.reshape(rows, _LANES)
    hr2 = hr.reshape(rows, _LANES)
    z2 = z.reshape(rows, _LANES)

    tile_spec = pl.BlockSpec((block_rows, _LANES), lambda i: (i, 0))
    smem_spec = pl.BlockSpec(memory_space=pltpu.MemorySpace.SMEM)
    out_spec = pl.BlockSpec((1, _SUBLANES, _LANES), lambda i: (i, 0, 0))
    out_shape = jax.ShapeDtypeStruct((num_blocks, _SUBLANES, _LANES), jnp.float32)
    cparams = pltpu.CompilerParams(dimension_semantics=("parallel",),
                                   vmem_limit_bytes=32 * 1024 * 1024)
    out_bytes = num_blocks * _SUBLANES * _LANES * 4

    # ---- pass 1: sum(|sr - hr|) partials (z not streamed) ----
    partial1 = pl.pallas_call(
        functools.partial(_abs_diff_partial_kernel, valid_rows=rows),
        out_shape=out_shape,
        grid=(num_blocks,),
        in_specs=[tile_spec, tile_spec],
        out_specs=out_spec,
        compiler_params=cparams,
        cost_estimate=pl.CostEstimate(
            flops=3 * n, transcendentals=0,
            bytes_accessed=n * (sr.dtype.itemsize + hr.dtype.itemsize) + out_bytes),
    )(sr2, hr2)
    # Masked rows contribute 0, so divide by the true element count.
    mean_sigma = (jnp.sum(partial1) / jnp.float32(n)).reshape(1)

    # ---- pass 2: thresholded-L1 partials ----
    partial2 = pl.pallas_call(
        functools.partial(_loss_partial_kernel, valid_rows=rows),
        out_shape=out_shape,
        grid=(num_blocks,),
        in_specs=[smem_spec, tile_spec, tile_spec, tile_spec],
        out_specs=out_spec,
        compiler_params=cparams,
        cost_estimate=pl.CostEstimate(
            flops=8 * n, transcendentals=0,
            bytes_accessed=n * (sr.dtype.itemsize + hr.dtype.itemsize
                                + z.dtype.itemsize) + out_bytes),
    )(mean_sigma, sr2, hr2, z2)

    loss = jnp.sum(partial2) / jnp.float32(n)
    # TODO(synk): loss_logger.cache_in('Train/Loss/Posterior', ...) is host-side
    # logging with no Pallas equivalent.
    return jnp.asarray(coef, jnp.float32) * loss


def _reference(sr, hr, coef, z):
    sr, hr, z = (a.astype(jnp.float32) for a in (sr, hr, z))
    sigma = jnp.abs(sr - hr)
    sigma = jnp.where(sigma < sigma.mean(), 0.0, sigma)
    return coef * jnp.mean(jnp.abs(hr - (sr + sigma * z)))


if __name__ == "__main__":
    key = jax.random.PRNGKey(0)
    coef = 0.5

    # (shape, dtype, min_pallas_elems): 0 forces the Pallas path at small sizes.
    cases = [
        ((2, 4, 16, 16), jnp.float32, 0),              # lane-aligned, 2-block even split
        ((2, 4, 16, 24), jnp.float32, 0),              # partial final block -> in-kernel mask
        ((2, 4, 16, 16), jnp.bfloat16, 0),             # native 16-bit streaming, f32 accum
        ((2, 3, 7, 5), jnp.float32, _MIN_PALLAS_ELEMS),  # tiny/unaligned -> fused XLA fallback
    ]

    for idx, (shape, dtype, min_elems) in enumerate(cases):
        k_sr, k_hr, k_z = jax.random.split(jax.random.fold_in(key, idx), 3)
        sr = jax.random.normal(k_sr, shape, jnp.float32)
        hr = sr + 0.1 * jax.random.normal(k_hr, shape, jnp.float32)
        # z plays the role of torch.randn_like(sr); drawn in glue for determinism.
        z = jax.random.normal(k_z, shape, jnp.float32)
        sr, hr, z = sr.astype(dtype), hr.astype(dtype), z.astype(dtype)

        out = posterior_loss(sr, hr, coef, z=z, min_pallas_elems=min_elems)
        jax.block_until_ready(out)

        ref = _reference(sr, hr, coef, z)
        tol = 2e-3 if dtype == jnp.bfloat16 else 1e-4
        assert jnp.allclose(out, ref, rtol=tol, atol=1e-5), (shape, dtype, out, ref)

    print("KERNEL_OK")
</pallas_src>

<mosaic_0001>
module attributes {stable_mosaic.version = 11 : i64} {
  func.func @_abs_diff_partial_kernel(%arg0: i32, %arg1: memref<8x128xf32, #tpu.memory_space<vmem>>, %arg2: memref<8x128xf32, #tpu.memory_space<vmem>>, %arg3: memref<1x8x128xf32, #tpu.memory_space<vmem>>) attributes {dimension_semantics = [#tpu.dimension_semantics<parallel>], iteration_bounds = array<i64: 2>, scalar_prefetch = 0 : i64, scratch_operands = 0 : i64, tpu.core_type = #tpu.core_type<tc>, window_params = [{transform_indices = @transform_0, window_bounds = array<i64: 8, 128>}, {transform_indices = @transform_1, window_bounds = array<i64: 8, 128>}, {transform_indices = @transform_2, window_bounds = array<i64: 1, 8, 128>}]} {
    %c0 = arith.constant 0 : index
    %c0_0 = arith.constant 0 : index
    %0 = vector.load %arg1[%c0, %c0_0] : memref<8x128xf32, #tpu.memory_space<vmem>>, vector<8x128xf32>
    %c0_1 = arith.constant 0 : index
    %c0_2 = arith.constant 0 : index
    %1 = vector.load %arg2[%c0_1, %c0_2] : memref<8x128xf32, #tpu.memory_space<vmem>>, vector<8x128xf32>
    %2 = arith.subf %0, %1 : vector<8x128xf32>
    %3 = math.absf %2 : vector<8x128xf32>
    %4 = vector.shape_cast %3 : vector<8x128xf32> to vector<1x8x128xf32>
    %cst = arith.constant dense<0.000000e+00> : vector<8x128xf32>
    %5 = vector.multi_reduction <add>, %4, %cst [0] : vector<1x8x128xf32> to vector<8x128xf32>
    %6 = vector.shape_cast %5 : vector<8x128xf32> to vector<1x8x128xf32>
    %c0_3 = arith.constant 0 : index
    %c0_4 = arith.constant 0 : index
    %c0_5 = arith.constant 0 : index
    %7 = vector.load %arg3[%c0_3, %c0_4, %c0_5] : memref<1x8x128xf32, #tpu.memory_space<vmem>>, vector<1x8x128xf32>
    tpu.vector_store %arg3[%c0_3, %c0_4, %c0_5], %6 {strides = array<i32>} : memref<1x8x128xf32, #tpu.memory_space<vmem>>, vector<1x8x128xf32>,
    return
  }
  func.func @transform_0(%arg0: i32) -> (i32, i32) {
    %c0_i32 = arith.constant 0 : i32
    %c0_i32_0 = arith.constant 0 : i32
    return %arg0, %c0_i32 : i32, i32
  }
  func.func @transform_1(%arg0: i32) -> (i32, i32) {
    %c0_i32 = arith.constant 0 : i32
    %c0_i32_0 = arith.constant 0 : i32
    return %arg0, %c0_i32 : i32, i32
  }
  func.func @transform_2(%arg0: i32) -> (i32, i32, i32) {
    %c0_i32 = arith.constant 0 : i32
    %c0_i32_0 = arith.constant 0 : i32
    %c0_i32_1 = arith.constant 0 : i32
    return %arg0, %c0_i32, %c0_i32_0 : i32, i32, i32
  }
}

</mosaic_0001>

<bundles_post_ra>
// kernel: tpu_custom_call.1
= control target key start
LH: loop header
LB: loop body
LE: loop exit
PB: predicated region body
PF: predicated region fallthrough
CT: control target
= control target key end

     0   :  { %7 = vsyncpa [#allocation3], 0  ;;  %s713_s0 = inlined_call_operand.hbm [shape: f32[16,128], index: 0, kind: input, shape index: {}]   ;;  %s714_s1 = inlined_call_operand.hbm [shape: f32[16,128], index: 1, kind: input, shape index: {}]   ;;  %s715_s2 = inlined_call_operand.hbm [shape: f32[2,8,128], index: 2, kind: output, shape index: {}]  }
   0x1   :  { %9 = vsyncpa [#allocation3 + $0x1], 0 }
   0x2   :  { %10 = vsyncpa [#allocation6], 0 }
   0x3   :  { %12 = vsyncpa [#allocation6 + $0x1], 0 }
   0x4   :  { %13 = vsyncpa [#allocation4], 0 }
   0x5   :  { %15 = vsyncpa [#allocation4 + $0x1], 0  ;;  %s519_s9 = smov 0   ;;  %s521_s10 = smov 0  }
   0x6   :  { %s523_s11 = smov 0   ;;  %s525_s12 = smov 0  }
   0x7 LB: > { %s540_s13 = sadd.s32 4294967295, %s499_s12   ;;  %s309_s14 = sadd.s32 4294967294, %s499_s12   ;;  %s499_s12 = sphi %s525_s12, %s734_s12   ;;  %s495_s11 = sphi %s523_s11, %s733_s11   ;;  %s491_s10 = sphi %s521_s10, %s732_s10   ;;  %s487_s9 = sphi %s519_s9, %s731_s9  }
   0x8   : > { %s544_s15 = sadd.s32 1, %s499_s12   ;;  %s28_s16 = sadd.s32 1, %s495_s11 }
   0x9   : > { %s25_s17 = ssub.s32 %s499_s12, %s544_s15  ;;  %p35_p0 = scmp.ne.s32.totalorder %s495_s11, %s491_s10 }
   0xa   : > { %p26_p1 = scmp.eq.s32.totalorder %s25_s17, 0  ;;  %p36_p2 = scmp.eq.s32.totalorder %s499_s12, 0 }
   0xb   : > { %p41_p3 = scmp.ne.s32.totalorder %s491_s10, %s487_s9  ;;  %p42_p4 = scmp.eq.s32.totalorder %s540_s13, 0 }
   0xc   : > { %s556_s18 = scalar_select %p26_p1, %s495_s11, %s28_s16  }
   0xd   : > { %p558_p5 = por %p36_p2, %p35_p0  ;;  %p562_p6 = por %p42_p4, %p41_p3 }
   0xe   : > { %p91_p7 = scmp.eq.s32.totalorder %s540_s13, 1  ;;  %p97_p8 = scmp.eq.s32.totalorder %s309_s14, 1 }
   0xf   : > { %s719_s20 = scalar_select %p562_p6, 1, 0 }
  0x10   : > { %p341_p10 = scmp.lt.s32.totalorder %s499_s12, 2  ;;  %p569_p11 = por %p91_p7, %p35_p0 }
  0x11   : > { %p573_p12 = por %p97_p8, %p41_p3  ;;  %s578_s23 = sand.u32 1, %s495_s11  }
  0x12   : > { %s720_s21 = scalar_select %p569_p11, 1, 0 }
  0x13   : > { %s721_s22 = scalar_select %p573_p12, 1, 0 }
  0x14   : > { %s313_s24 = sshll.u32 %s499_s12, 7  ;;  %s312_s25 = sshll.u32 %s578_s23, 3 }
  0x15   : > { %s587_s28 = scalar_lea.hbm %s713_s0, %s313_s24  ;;  %s121_s29 = scalar_lea.vmem [#allocation2], %s312_s25 }
  0x16   : > { %s128_s30 = sshll.u32 %s121_s29, 4  ;;  %p593_p13 = pnand %p341_p10, %p558_p5  ;;  %s597_s30 = int_to_ptr.vmem [resolvable:$true] %s128_s30 }
  0x17   : > { %s118_s4 = scalar_lea.sflag [#allocation3], %s578_s23  ;;  %s375_s5 = scalar_lea.hbm %s587_s28, 128 }
  0x18   : > { %p376_p2 = scmp.ne.s32.totalorder %s587_s28, %s375_s5  ;;  %p377_p3 = pneg %p593_p13 }
  0x19   : > { %s380_s8 = scalar_lea.hbm %s713_s0, 256  ;;  %p381_p5 = scmp.lt.s32.totalorder %s587_s28, %s713_s0 }
  0x1a   : > { %p378_p4 = pnand %p377_p3, %p376_p2  ;;  %p382_p8 = scmp.lt.s32.totalorder %s380_s8, %s375_s5 }
  0x1c   : > { %p379_p7 = pneg %p378_p4  ;;  %p383_p10 = por %p382_p8, %p381_p5 }
  0x1e   : > { %p384_p9 = pnand %p383_p10, %p379_p7 }
  0x20   : > { %387 = shalt.err (!%p384_p9)
}
  0x21   : > { %s388_s17 = scalar_lea.vmem %s597_s30, 128  ;;  %s501_s19 = smov [#allocation2]  }
  0x22   : > { %p389_p0 = scmp.ne.s32.totalorder %s597_s30, %s388_s17  ;;  %s393_s26 = sshll.u32 %s501_s19, 4  ;;  %s394_s26 = int_to_ptr.vmem [resolvable:$false] %s393_s26 }
  0x23   : > { %s395_s27 = scalar_lea.vmem %s394_s26, 256  ;;  %p396_p1 = scmp.lt.s32.totalorder %s597_s30, %s394_s26 }
  0x24   : > { %p391_p2 = pnand %p389_p0, %p377_p3  ;;  %p397_p12 = scmp.lt.s32.totalorder %s395_s27, %s388_s17 }
  0x26   : > { %p392_p4 = pneg %p391_p2  ;;  %p398_p11 = por %p397_p12, %p396_p1 }
  0x28   : > { %p399_p5 = pnand %p398_p11, %p392_p4 }
  0x2a   : > { %402 = shalt.err (!%p399_p5)
}
  0x2b   : > { %333 = dma.hbm_to_vmem [thread:$0]  (!%p593_p13), %s587_s28, 128, %s597_s30, %s118_s4  }
  0x2c   : > { %p723_p9 = scmp.lt.s32.totalorder %s499_s12, 3  ;;  %p724_p0 = scmp.ge.s32.totalorder %s499_s12, 1 }
  0x2d   : > { %s639_s7 = scalar_lea.hbm %s714_s1, %s313_s24  ;;  %s139_s8 = scalar_lea.vmem [#allocation5], %s312_s25 }
  0x2e   : > { %p630_p7 = pnand %p724_p0, %p723_p9  ;;  %s146_s14 = sshll.u32 %s139_s8, 4  ;;  %s147_s14 = int_to_ptr.vmem [resolvable:$true] %s146_s14 }
  0x2f   : > { %s136_s28 = scalar_lea.sflag [#allocation6], %s578_s23  ;;  %s403_s30 = scalar_lea.hbm %s639_s7, 128 }
  0x30   : > { %s725_s29 = scalar_select %p630_p7, 1, 0 }
  0x31   : > { %p404_p11 = scmp.ne.s32.totalorder %s639_s7, %s403_s30  ;;  %s408_s17 = scalar_lea.hbm %s714_s1, 256 }
  0x32   : > { %p409_p8 = scmp.lt.s32.totalorder %s639_s7, %s714_s1  ;;  %p410_p10 = scmp.lt.s32.totalorder %s408_s17, %s403_s30 }
  0x33   : > { %p406_p12 = pnand %p404_p11, %p377_p3 }
  0x34   : > { %p411_p2 = por %p410_p10, %p409_p8 }
  0x35   : > { %p407_p1 = pneg %p406_p12 }
  0x37   : > { %p412_p4 = pnand %p411_p2, %p407_p1 }
  0x39   : > { %415 = shalt.err (!%p412_p4)
}
  0x3a   : > { %s416_s25 = scalar_lea.vmem %s147_s14, 128  ;;  %s502_s23 = smov [#allocation5]  }
  0x3b   : > { %p417_p5 = scmp.ne.s32.totalorder %s147_s14, %s416_s25  ;;  %s421_s26 = sshll.u32 %s502_s23, 4  ;;  %s422_s26 = int_to_ptr.vmem [resolvable:$false] %s421_s26 }
  0x3c   : > { %s423_s27 = scalar_lea.vmem %s422_s26, 256  ;;  %p424_p11 = scmp.lt.s32.totalorder %s147_s14, %s422_s26 }
  0x3d   : > { %p419_p9 = pnand %p417_p5, %p377_p3  ;;  %p425_p12 = scmp.lt.s32.totalorder %s423_s27, %s416_s25 }
  0x3f   : > { %p420_p0 = pneg %p419_p9  ;;  %p426_p6 = por %p425_p12, %p424_p11 }
  0x41   : > { %p427_p7 = pnand %p426_p6, %p420_p0 }
  0x43   : > { %430 = shalt.err (!%p427_p7)
}
  0x44   : > { %336 = dma.hbm_to_vmem [thread:$0]  (!%p593_p13), %s639_s7, 128, %s147_s14, %s136_s28  }
  0x45   : > { %p726_p1 = scmp.ne.s32.totalorder %s725_s29, 0 }
  0x46   : > { %s665_s5 = sand.u32 (!%p726_p1), 1, %s491_s10   ;;  %p727_p3 = scmp.ne.s32.totalorder (!%p726_p1), %s719_s20, 0 }
  0x47   : > { %155 = sbr.rel (%p726_p1) target bundleno = 104 (0x68), region = 28  ;;  %s317_s6 = sshll.u32 (!%p726_p1), %s665_s5, 3 }
  0x48   : > { %s158_s8 = scalar_lea.sflag (!%p726_p1), [#allocation3], %s665_s5  ;;  %s161_s30 = scalar_lea.vmem (!%p726_p1), [#allocation2], %s317_s6 }
  0x4c   : > { %474 = dma.done.wait (%p727_p3), %s158_s8, 128  }
  0x4d   : > { %476 = vsyncadd (%p727_p3), %s158_s8, 4294967168  ;;  %s167_s3 = scalar_lea.sflag [#allocation6], %s665_s5  ;;  %s170_s7 = scalar_lea.vmem [#allocation5], %s317_s6 }
  0x4e   : > { %478 = dma.done.wait (%p727_p3), %s167_s3, 128  }
  0x4f   : > { %480 = vsyncadd (%p727_p3), %s167_s3, 4294967168  ;;  %v196_v0 = vld [vmem:[%s161_s30] sm:$0xff]  ;;  %v197_v1 = vld [vmem:[%s170_s7] sm:$0xff]  ;;  %s195_s29 = scalar_lea.vmem [#allocation7], %s317_s6  ;;  %s321_s28 = sshll.u32 %s540_s13, 7 }
  0x50   : > { %s216_s14 = sshll.u32 %s195_s29, 4  ;;  %v198_v2 = vsub.f32 %v196_v0, %v197_v1  ;;  %s214_s17 = scalar_lea.hbm %s715_s2, %s321_s28  ;;  %s217_s14 = int_to_ptr.vmem [resolvable:$true] %s216_s14 }
  0x51   : > { %s203_s24 = scalar_lea.sflag [#allocation4], %s665_s5  ;;  %s431_s19 = scalar_lea.vmem %s217_s14, 128 }
  0x52   : > { %v199_v3 = vand.u32 2147483647, %v198_v2  ;;  %p432_p6 = scmp.ne.s32.totalorder %s217_s14, %s431_s19  ;;  %p728_p13 = scmp.ne.s32.totalorder %s720_s21, 0 }
  0x53   : > { %s503_s20 = smov [#allocation7]  }
  0x54   : > { %201 = vst [vmem:[%s195_s29] sm:$0xff] %v199_v3  ;;  %p433_p7 = pnand %p432_p6, %p728_p13  ;;  %s435_s25 = sshll.u32 %s503_s20, 4  ;;  %s436_s25 = int_to_ptr.vmem [resolvable:$false] %s435_s25 }
  0x55   : > { %s437_s23 = scalar_lea.vmem %s436_s25, 256  ;;  %p438_p10 = scmp.lt.s32.totalorder %s217_s14, %s436_s25 }
  0x56   : > { %p434_p8 = pneg %p433_p7  ;;  %p439_p2 = scmp.lt.s32.totalorder %s437_s23, %s431_s19 }
  0x58   : > { %p440_p4 = por %p439_p2, %p438_p10 }
  0x5a   : > { %p441_p5 = pnand %p440_p4, %p434_p8 }
  0x5c   : > { %444 = shalt.err (!%p441_p5)
}
  0x5d   : > { %s445_s13 = scalar_lea.hbm %s214_s17, 128  ;;  %s449_s5 = scalar_lea.hbm %s715_s2, 256 }
  0x5e   : > { %p446_p9 = scmp.ne.s32.totalorder %s214_s17, %s445_s13  ;;  %p450_p12 = scmp.lt.s32.totalorder %s214_s17, %s715_s2 }
  0x5f   : > { %p451_p1 = scmp.lt.s32.totalorder %s449_s5, %s445_s13 }
  0x60   : > { %p447_p0 = pnand %p446_p9, %p728_p13 }
  0x61   : > { %p452_p3 = por %p451_p1, %p450_p12 }
  0x62   : > { %p448_p11 = pneg %p447_p0 }
  0x64   : > { %p453_p6 = pnand %p452_p3, %p448_p11 }
  0x66   : > { %456 = shalt.err (!%p453_p6)
}
  0x67   : > { %328 = dma.vmem_to_hbm [thread:$0]  (%p728_p13), %s217_s14, 128, %s214_s17, %s203_s24  }
  0x68 PF: > { %s228_s30 = sand.u32 1, %s487_s9   ;;  %p729_p7 = scmp.ne.s32.totalorder %s721_s22, 0 }
  0x69   : > { %p730_p8 = scmp.ge.s32.totalorder %s499_s12, 2  ;;  %s229_s3 = scalar_lea.sflag [#allocation4], %s228_s30 }
  0x6b   : > { %p338_p10 = pnand %p730_p8, %p729_p7 }
  0x6d   : > { %p339_p2 = pneg %p338_p10 }
  0x6f   : > { %482 = dma.done.wait (%p339_p2), %s229_s3, 128  }
  0x70   : > { %484 = vsyncadd (%p339_p2), %s229_s3, 4294967168  ;;  %p18_p4 = scmp.ge.s32.totalorder %s544_s15, 4   ;;  %s731_s9 = smov %s491_s10 }
  0x71   : > { %s732_s10 = smov %s495_s11  ;;  %s733_s11 = smov %s556_s18 }
  0x72   : > { %s734_s12 = smov %s544_s15  ;;  %20 = sbr.rel (!%p18_p4) target bundleno = 7 (0x7), region = 86 }
  0x77   :  { %234 = vsyncpa [#allocation3], 1 }
  0x78   :  { %236 = vsyncpa [#allocation3 + $0x1], 1 }
  0x79   :  { %237 = vsyncpa [#allocation6], 1 }
  0x7a   :  { %239 = vsyncpa [#allocation6 + $0x1], 1 }
  0x7b   :  { %240 = vsyncpa [#allocation4], 1 }
  0x7c   :  { %242 = vsyncpa [#allocation4 + $0x1], 1 }

</bundles_post_ra>
